<compile_context>
chip_gen: v7x
topology: tpu7x:2x2x1
jax: 0.10.0
libtpu: 0.0.40
codegen_flags: <defaults>
</compile_context>

<pallas_src>
import functools

import jax
import jax.numpy as jnp
import numpy as np
from jax.experimental import pallas as pl
from jax.experimental.pallas import tpu as pltpu


def _round_up(x, m):
    return (x + m - 1) // m * m


def _layer_norm(x, gamma, beta, eps):
    # Doc2EDAG (annotated-transformer) LayerNorm:
    #   a_2 * (x - mean) / (std + eps) + b_2, std unbiased (N-1), eps on std.
    h = x.shape[-1]
    mean = jnp.mean(x, axis=-1, keepdims=True)
    xc = x - mean
    var_unbiased = jnp.sum(xc * xc, axis=-1, keepdims=True) * (1.0 / (h - 1))
    denom = jnp.sqrt(var_unbiased) + eps
    inv = pl.reciprocal(denom, approx=True)   # EUP slot, off the VALU budget
    inv = inv * (2.0 - denom * inv)           # one Newton step -> ~f32 accuracy
    return (xc * inv) * gamma + beta


def _ner_embed_resident_kernel(
    ids_ref,      # SMEM (B * S_pad,) int32 — scalar-prefetched token ids
    tok_ref,      # VMEM (V, H) token table, resident (constant block)
    pos_ref,      # VMEM (S_pad, H) positional table, resident (constant block)
    gamma_ref,    # VMEM (1, H) LayerNorm a_2
    beta_ref,     # VMEM (1, H) LayerNorm b_2
    o_ref,        # VMEM (TILE_S, H) output tile (batch dim squeezed)
    gat_ref,      # VMEM scratch (TILE_S, H), dtype of token table
    *, tile_s, s_pad, eps,
):
    b = pl.program_id(0)
    j = pl.program_id(1)
    base = b * s_pad + j * tile_s

    # In-VMEM gather: TILE_S dynamic row reads from the resident table.
    @pl.loop(0, tile_s)
    def _(r):
        tid = ids_ref[base + r]
        gat_ref[pl.ds(r, 1), :] = tok_ref[pl.ds(tid, 1), :]

    pos_start = pl.multiple_of(j * tile_s, 8)
    x = gat_ref[...].astype(jnp.float32) \
        + pos_ref[pl.ds(pos_start, tile_s), :].astype(jnp.float32)
    y = _layer_norm(x, gamma_ref[...], beta_ref[...], eps)
    o_ref[...] = y.astype(o_ref.dtype)


def _ner_embed_hbm_kernel(
    ids_ref,      # SMEM (B * S_pad,) int32
    tok_hbm,      # HBM  (V, H) token table (memory_space=pl.ANY)
    pos_ref,      # VMEM (S_pad, H) positional table, resident
    gamma_ref,    # VMEM (1, H)
    beta_ref,     # VMEM (1, H)
    o_ref,        # VMEM (TILE_S, H)
    gat_ref,      # VMEM scratch (TILE_S, H)
    sems,         # DMA semaphores (2, CHUNK) — round-robin chunk slots
    *, tile_s, s_pad, chunk, eps,
):
    b = pl.program_id(0)
    j = pl.program_id(1)
    base = b * s_pad + j * tile_s
    n_chunks = tile_s // chunk
    pending = [None, None]

    def issue(k):
        slot = k % 2
        cps = []
        for i in range(chunk):
            r = k * chunk + i
            tid = ids_ref[base + r]     # scalar reads before any .wait()
            cp = pltpu.make_async_copy(tok_hbm.at[tid], gat_ref.at[r],
                                       sems.at[slot, i])
            cp.start()
            cps.append(cp)
        pending[slot] = cps

    issue(0)
    for k in range(n_chunks):           # static unrolled chunk loop
        slot = k % 2
        if k + 1 < n_chunks:
            issue(k + 1)                # next chunk's DMAs fly during compute
        for cp in pending[slot]:        # wait on the started descriptors
            cp.wait()
        row0 = k * chunk
        pos_start = pl.multiple_of(j * tile_s + row0, 8)
        x = gat_ref[pl.ds(row0, chunk), :].astype(jnp.float32) \
            + pos_ref[pl.ds(pos_start, chunk), :].astype(jnp.float32)
        y = _layer_norm(x, gamma_ref[...], beta_ref[...], eps)
        o_ref[pl.ds(row0, chunk), :] = y.astype(o_ref.dtype)


def ner_token_embedding(token_ids, tok_table, pos_table, gamma, beta, *,
                        eps=1e-6, tile_s=None, out_dtype=jnp.float32,
                        vmem_budget_bytes=56 * 1024 * 1024,
                        force_hbm_gather=False):
    B, S = token_ids.shape
    V, H = tok_table.shape
    P = pos_table.shape[0]
    if S > P:
        raise ValueError(
            f"sent_len={S} exceeds pos_embedding rows={P} "
            f"(the PyTorch module would index out of range)")

    if tile_s is None:
        tile_s = min(256, _round_up(S, 8))
    tile_s = max(8, _round_up(tile_s, 8))
    s_pad = _round_up(S, tile_s)
    n_j = s_pad // tile_s

    # Clamp ids (neither the VMEM row read nor the DMA source is bounds
    # checked), pad the sequence axis to the tile, flatten to 1-D for SMEM
    # (2-D SMEM would pad to [ceil(B/8)*8, ceil(S/128)*128] words).
    ids = jnp.clip(token_ids.astype(jnp.int32), 0, V - 1)
    if s_pad != S:
        ids = jnp.pad(ids, ((0, 0), (0, s_pad - S)))
    ids_flat = ids.reshape(B * s_pad)

    # Positional rows padded to the tiled length (padded tail is discarded).
    pos = pos_table[:min(P, s_pad)]
    if pos.shape[0] < s_pad:
        pos = jnp.pad(pos, ((0, s_pad - pos.shape[0]), (0, 0)))
    pos = pos.astype(tok_table.dtype)

    gamma2 = gamma.reshape(1, H).astype(jnp.float32)
    beta2 = beta.reshape(1, H).astype(jnp.float32)

    itemsize = jnp.dtype(tok_table.dtype).itemsize
    table_bytes = V * H * itemsize
    pos_bytes = s_pad * H * itemsize
    gat_bytes = tile_s * H * itemsize
    out_bytes = tile_s * H * jnp.dtype(out_dtype).itemsize
    # Pipeline double-buffers inputs/outputs even for constant-index blocks.
    resident_need = 2 * table_bytes + 2 * pos_bytes + gat_bytes + 2 * out_bytes + 8 * H * 4
    hbm_need = 2 * pos_bytes + gat_bytes + 2 * out_bytes + 8 * H * 4

    use_resident = (not force_hbm_gather) and (resident_need <= vmem_budget_bytes)
    vmem_need = resident_need if use_resident else hbm_need
    vmem_limit = int(min(100 * (1 << 20), max(32 * (1 << 20), vmem_need + (4 << 20))))

    common_specs = [
        # Whole (padded) positional table: constant block -> DMA'd once, copy
        # elided on every later grid step; sliced per tile in-kernel.
        pl.BlockSpec((s_pad, H), lambda b, j, ids: (0, 0)),
        # LayerNorm scale / shift (constant blocks, copies elided).
        pl.BlockSpec((1, H), lambda b, j, ids: (0, 0)),
        pl.BlockSpec((1, H), lambda b, j, ids: (0, 0)),
    ]
    out_spec = pl.BlockSpec((None, tile_s, H), lambda b, j, ids: (b, j, 0))

    if use_resident:
        kernel = functools.partial(_ner_embed_resident_kernel,
                                   tile_s=tile_s, s_pad=s_pad, eps=eps)
        in_specs = [pl.BlockSpec((V, H), lambda b, j, ids: (0, 0))] + common_specs
        scratch_shapes = [pltpu.VMEM((tile_s, H), tok_table.dtype)]
    else:
        chunk = 8
        kernel = functools.partial(_ner_embed_hbm_kernel,
                                   tile_s=tile_s, s_pad=s_pad, chunk=chunk, eps=eps)
        in_specs = [pl.BlockSpec(memory_space=pl.ANY)] + common_specs
        scratch_shapes = [
            pltpu.VMEM((tile_s, H), tok_table.dtype),
            pltpu.SemaphoreType.DMA((2, chunk)),
        ]

    grid_spec = pltpu.PrefetchScalarGridSpec(
        num_scalar_prefetch=1,
        grid=(B, n_j),
        in_specs=in_specs,
        out_specs=out_spec,
        scratch_shapes=scratch_shapes,
    )

    out = pl.pallas_call(
        kernel,
        out_shape=jax.ShapeDtypeStruct((B, s_pad, H), out_dtype),
        grid_spec=grid_spec,
        compiler_params=pltpu.CompilerParams(
            # No cross-step state: both axes are independent, so v7x's two
            # TensorCores can shard the grid (no-op on v5e/v6e).
            dimension_semantics=("parallel", "parallel"),
            vmem_limit_bytes=vmem_limit,
        ),
    )(ids_flat, tok_table, pos, gamma2, beta2)

    if s_pad != S:
        out = out[:, :S, :]
    return out


def _reference(token_ids, tok_table, pos_table, gamma, beta, eps=1e-6):
    B, S = token_ids.shape
    tok = tok_table[token_ids]                              # (B, S, H)
    pos = pos_table[jnp.arange(S)][None, :, :]              # (1, S, H)
    x = tok + pos
    mean = jnp.mean(x, axis=-1, keepdims=True)
    xc = x - mean
    std = jnp.sqrt(jnp.sum(xc * xc, axis=-1, keepdims=True) / (x.shape[-1] - 1))
    return gamma * xc / (std + eps) + beta


if __name__ == "__main__":
    key = jax.random.PRNGKey(0)
    k_ids, k_tok, k_pos = jax.random.split(key, 3)

    batch, seq, hidden = 2, 8, 128
    vocab_size, max_sent_len = 64, 16

    token_ids = jax.random.randint(k_ids, (batch, seq), 0, vocab_size, dtype=jnp.int32)
    tok_table = (0.02 * jax.random.normal(k_tok, (vocab_size, hidden))).astype(jnp.float32)
    pos_table = (0.02 * jax.random.normal(k_pos, (max_sent_len, hidden))).astype(jnp.float32)
    gamma = jnp.ones((hidden,), jnp.float32)   # LayerNorm a_2
    beta = jnp.zeros((hidden,), jnp.float32)   # LayerNorm b_2

    out = ner_token_embedding(token_ids, tok_table, pos_table, gamma, beta)
    out = jax.block_until_ready(out)

    ref = _reference(token_ids, tok_table, pos_table, gamma, beta)
    np.testing.assert_allclose(np.asarray(out), np.asarray(ref), rtol=1e-5, atol=1e-5)

    print("KERNEL_OK")
</pallas_src>

<mosaic_0001>
module attributes {stable_mosaic.version = 11 : i64} {
  func.func @_ner_embed_resident_kernel(%arg0: i32, %arg1: i32, %arg2: memref<16xi32, #tpu.memory_space<smem>>, %arg3: memref<64x128xf32, #tpu.memory_space<vmem>>, %arg4: memref<8x128xf32, #tpu.memory_space<vmem>>, %arg5: memref<1x128xf32, #tpu.memory_space<vmem>>, %arg6: memref<1x128xf32, #tpu.memory_space<vmem>>, %arg7: memref<1x8x128xf32, #tpu.memory_space<vmem>>, %arg8: memref<8x128xf32, #tpu.memory_space<vmem>>) attributes {dimension_semantics = [#tpu.dimension_semantics<parallel>, #tpu.dimension_semantics<parallel>], iteration_bounds = array<i64: 2, 1>, scalar_prefetch = 1 : i64, scratch_operands = 1 : i64, tpu.core_type = #tpu.core_type<tc>, window_params = [{pipeline_mode = #tpu.pipeline_mode<synchronous>, transform_indices = @transform_0, window_bounds = array<i64: 64, 128>}, {pipeline_mode = #tpu.pipeline_mode<synchronous>, transform_indices = @transform_1, window_bounds = array<i64: 8, 128>}, {pipeline_mode = #tpu.pipeline_mode<synchronous>, transform_indices = @transform_2, window_bounds = array<i64: 1, 128>}, {pipeline_mode = #tpu.pipeline_mode<synchronous>, transform_indices = @transform_3, window_bounds = array<i64: 1, 128>}, {transform_indices = @transform_4, window_bounds = array<i64: 1, 8, 128>}]} {
    %c8_i32 = arith.constant 8 : i32
    %0 = arith.muli %arg0, %c8_i32 : i32
    %c8_i32_0 = arith.constant 8 : i32
    %1 = arith.muli %arg1, %c8_i32_0 : i32
    %2 = arith.addi %0, %1 : i32
    %c0_i32 = arith.constant 0 : i32
    %c8_i32_1 = arith.constant 8 : i32
    %3 = arith.addi %c0_i32, %c8_i32_1 : i32
    %c1_i32 = arith.constant 1 : i32
    scf.for %arg9 = %c0_i32 to %3 step %c1_i32  : i32 {
      %c1_i32_18 = arith.constant 1 : i32
      %40 = arith.muli %arg9, %c1_i32_18 : i32
      %c0_i32_19 = arith.constant 0 : i32
      %41 = arith.addi %c0_i32_19, %40 : i32
      %42 = arith.addi %2, %41 : i32
      %43 = arith.index_cast %42 : i32 to index
      %44 = memref.load %arg2[%43] : memref<16xi32, #tpu.memory_space<smem>>
      %45 = arith.index_cast %44 : i32 to index
      %c0_20 = arith.constant 0 : index
      %46 = vector.load %arg3[%45, %c0_20] : memref<64x128xf32, #tpu.memory_space<vmem>>, vector<1x128xf32>
      %47 = arith.index_cast %41 : i32 to index
      %c0_21 = arith.constant 0 : index
      %48 = vector.load %arg8[%47, %c0_21] : memref<8x128xf32, #tpu.memory_space<vmem>>, vector<1x128xf32>
      tpu.vector_store %arg8[%47, %c0_21], %46 {strides = array<i32>} : memref<8x128xf32, #tpu.memory_space<vmem>>, vector<1x128xf32>,
    }
    %c8_i32_2 = arith.constant 8 : i32
    %c8_i32_3 = arith.constant 8 : i32
    %4 = arith.muli %arg1, %c8_i32_3 : i32
    %5 = tpu.assume_multiple %4, 8 : i32
    %c0 = arith.constant 0 : index
    %c0_4 = arith.constant 0 : index
    %6 = vector.load %arg8[%c0, %c0_4] : memref<8x128xf32, #tpu.memory_space<vmem>>, vector<8x128xf32>
    %7 = arith.index_cast %5 : i32 to index
    %c0_5 = arith.constant 0 : index
    %8 = vector.load %arg4[%7, %c0_5] : memref<8x128xf32, #tpu.memory_space<vmem>>, vector<8x128xf32>
    %9 = arith.addf %6, %8 : vector<8x128xf32>
    %c0_6 = arith.constant 0 : index
    %c0_7 = arith.constant 0 : index
    %10 = vector.load %arg5[%c0_6, %c0_7] : memref<1x128xf32, #tpu.memory_space<vmem>>, vector<1x128xf32>
    %c0_8 = arith.constant 0 : index
    %c0_9 = arith.constant 0 : index
    %11 = vector.load %arg6[%c0_8, %c0_9] : memref<1x128xf32, #tpu.memory_space<vmem>>, vector<1x128xf32>
    %cst = arith.constant dense<0.000000e+00> : vector<8xf32>
    %12 = vector.multi_reduction <add>, %9, %cst [1] : vector<8x128xf32> to vector<8xf32>
    %13 = vector.shape_cast %12 : vector<8xf32> to vector<8x1xf32>
    %cst_10 = arith.constant 1.280000e+02 : f32
    %14 = vector.broadcast %cst_10 : f32 to vector<8x1xf32>
    %15 = arith.divf %13, %14 : vector<8x1xf32>
    %16 = vector.broadcast %15 : vector<8x1xf32> to vector<8x128xf32>
    %17 = arith.subf %9, %16 : vector<8x128xf32>
    %18 = arith.mulf %17, %17 : vector<8x128xf32>
    %cst_11 = arith.constant dense<0.000000e+00> : vector<8xf32>
    %19 = vector.multi_reduction <add>, %18, %cst_11 [1] : vector<8x128xf32> to vector<8xf32>
    %20 = vector.shape_cast %19 : vector<8xf32> to vector<8x1xf32>
    %cst_12 = arith.constant 0.00787401571 : f32
    %21 = vector.broadcast %cst_12 : f32 to vector<8x1xf32>
    %22 = arith.mulf %20, %21 : vector<8x1xf32>
    %23 = math.sqrt %22 : vector<8x1xf32>
    %cst_13 = arith.constant 9.99999997E-7 : f32
    %24 = vector.broadcast %cst_13 : f32 to vector<8x1xf32>
    %25 = arith.addf %23, %24 : vector<8x1xf32>
    %26 = tpu.reciprocal %25 {approx = true} : vector<8x1xf32> -> vector<8x1xf32>
    %27 = arith.mulf %25, %26 : vector<8x1xf32>
    %cst_14 = arith.constant 2.000000e+00 : f32
    %28 = vector.broadcast %cst_14 : f32 to vector<8x1xf32>
    %29 = arith.subf %28, %27 : vector<8x1xf32>
    %30 = arith.mulf %26, %29 : vector<8x1xf32>
    %31 = vector.broadcast %30 : vector<8x1xf32> to vector<8x128xf32>
    %32 = arith.mulf %17, %31 : vector<8x128xf32>
    %33 = vector.broadcast %10 : vector<1x128xf32> to vector<8x128xf32>
    %34 = arith.mulf %32, %33 : vector<8x128xf32>
    %35 = vector.broadcast %11 : vector<1x128xf32> to vector<8x128xf32>
    %36 = arith.addf %34, %35 : vector<8x128xf32>
    %c0_15 = arith.constant 0 : index
    %c0_16 = arith.constant 0 : index
    %c0_17 = arith.constant 0 : index
    %37 = vector.load %arg7[%c0_15, %c0_16, %c0_17] : memref<1x8x128xf32, #tpu.memory_space<vmem>>, vector<1x8x128xf32>
    %38 = vector.shape_cast %37 : vector<1x8x128xf32> to vector<8x128xf32>
    %39 = vector.shape_cast %36 : vector<8x128xf32> to vector<1x8x128xf32>
    tpu.vector_store %arg7[%c0_15, %c0_16, %c0_17], %39 {strides = array<i32>} : memref<1x8x128xf32, #tpu.memory_space<vmem>>, vector<1x8x128xf32>,
    return
  }
  func.func @transform_0(%arg0: i32, %arg1: i32, %arg2: memref<16xi32, #tpu.memory_space<smem>>) -> (i32, i32) {
    %c0_i32 = arith.constant 0 : i32
    %c0_i32_0 = arith.constant 0 : i32
    %c0_i32_1 = arith.constant 0 : i32
    return %c0_i32, %c0_i32_0 : i32, i32
  }
  func.func @transform_1(%arg0: i32, %arg1: i32, %arg2: memref<16xi32, #tpu.memory_space<smem>>) -> (i32, i32) {
    %c0_i32 = arith.constant 0 : i32
    %c0_i32_0 = arith.constant 0 : i32
    %c0_i32_1 = arith.constant 0 : i32
    return %c0_i32, %c0_i32_0 : i32, i32
  }
  func.func @transform_2(%arg0: i32, %arg1: i32, %arg2: memref<16xi32, #tpu.memory_space<smem>>) -> (i32, i32) {
    %c0_i32 = arith.constant 0 : i32
    %c0_i32_0 = arith.constant 0 : i32
    %c0_i32_1 = arith.constant 0 : i32
    return %c0_i32, %c0_i32_0 : i32, i32
  }
  func.func @transform_3(%arg0: i32, %arg1: i32, %arg2: memref<16xi32, #tpu.memory_space<smem>>) -> (i32, i32) {
    %c0_i32 = arith.constant 0 : i32
    %c0_i32_0 = arith.constant 0 : i32
    %c0_i32_1 = arith.constant 0 : i32
    return %c0_i32, %c0_i32_0 : i32, i32
  }
  func.func @transform_4(%arg0: i32, %arg1: i32, %arg2: memref<16xi32, #tpu.memory_space<smem>>) -> (i32, i32, i32) {
    %c0_i32 = arith.constant 0 : i32
    %c0_i32_0 = arith.constant 0 : i32
    return %arg0, %arg1, %c0_i32 : i32, i32, i32
  }
}

</mosaic_0001>

<bundles_post_ra>
// kernel: tpu_custom_call.1
= control target key start
LH: loop header
LB: loop body
LE: loop exit
PB: predicated region body
PF: predicated region fallthrough
CT: control target
= control target key end

     0   :  { %s902_s0 = inlined_call_operand.hbm [shape: s32[16], index: 0, kind: input, shape index: {}]   ;;  %s903_s1 = inlined_call_operand.hbm [shape: f32[64,128], index: 1, kind: input, shape index: {}]   ;;  %s904_s2 = inlined_call_operand.hbm [shape: f32[8,128], index: 2, kind: input, shape index: {}]   ;;  %s905_s3 = inlined_call_operand.vmem [shape: f32[1,128], index: 3, kind: input, shape index: {}]   ;;  %s906_s4 = inlined_call_operand.vmem [shape: f32[1,128], index: 4, kind: input, shape index: {}]   ;;  %s907_s5 = inlined_call_operand.hbm [shape: f32[2,8,128], index: 5, kind: output, shape index: {}]  }
   0x1   :  { %s490_s20 = scalar_lea.hbm %s902_s0, 16 }
   0x2   :  { %p491_p0 = scmp.ne.s32.totalorder %s902_s0, %s490_s20  ;;  %p494_p1 = scmp.lt.u32.totalorder %s490_s20, %s902_s0 }
   0x4   :  { %p496_p2 = pnand %p494_p1, %p491_p0 }
   0x6   :  { %499 = shalt.err (!%p496_p2)  }
   0x7   :  { %s654_s25 = smov [#allocation4]  }
   0x8   :  { %11 = dma.hbm_to_smem %s902_s0, 16, %s654_s25, [#allocation3] }
   0x9   :  { %612 = dma.done.wait [#allocation3], 16 }
   0xa   :  { %613 = vsyncadd [#allocation3], 4294967280 }
   0xb   :  { %13 = sfence }
   0xc   :  { %14 = vsyncpa [#allocation6], 0 }
   0xd   :  { %15 = vsyncpa [#allocation9], 0 }
   0xe   :  { %16 = vsyncpa [#allocation7], 0 }
   0xf   :  { %18 = vsyncpa [#allocation7 + $0x1], 0  ;;  %s702_s28 = smov 0   ;;  %s704_s29 = smov 0  }
  0x10   :  { %s706_s30 = smov 0   ;;  %s708_s6 = smov 0  }
  0x11   :  { %s710_s7 = smov 0   ;;  %s712_s8 = smov 0  }
  0x12 LB: > { %s383_s0 = sadd.s32 4294967295, %s648_s8   ;;  %s384_s9 = sadd.s32 4294967294, %s648_s8   ;;  %s648_s8 = sphi %s712_s8, %s24_s8   ;;  %s644_s7 = sphi %s710_s7, %s925_s7   ;;  %s640_s6 = sphi %s708_s6, %s924_s6   ;;  %s636_s30 = sphi %s706_s30, %s923_s30   ;;  %s632_s29 = sphi %s704_s29, %s922_s29   ;;  %s628_s28 = sphi %s702_s28, %s921_s28  }
  0x13   : > { %s36_s10 = sadd.s32 1, %s644_s7  ;;  %s129_s11 = sadd.s32 1, %s636_s30 }
  0x14   : > { %p38_p3 = scmp.ge.s32.totalorder %s36_s10, 2  ;;  %p139_p4 = scmp.ne.s32.totalorder %s636_s30, %s632_s29 }
  0x15   : > { %p140_p5 = scmp.eq.s32.totalorder %s383_s0, 1  ;;  %p145_p6 = scmp.ne.s32.totalorder %s632_s29, %s628_s28 }
  0x16   : > { %s927_s10 = smov (%p38_p3, %s36_s10), 0  ;;  %p146_p8 = scmp.eq.s32.totalorder %s384_s9, 1 }
  0x17   : > { %p742_p7 = por %p140_p5, %p139_p4  ;;  %s124_s13 = ssub.s32 %s644_s7, %s927_s10 }
  0x18   : > { %p385_p9 = scmp.ge.s32.totalorder %s648_s8, 1  ;;  %p127_p10 = scmp.eq.s32.totalorder %s124_s13, 0 }
  0x19   : > { %s912_s12 = scalar_select %p742_p7, 1, 0 }
  0x1a   : > { %p749_p11 = por %p146_p8, %p145_p6  ;;  %p153_p12 = scmp.lt.s32.totalorder %s648_s8, 3 }
  0x1b   : > { %s755_s15 = scalar_select %p127_p10, %s636_s30, %s129_s11  }
  0x1c   : > { %s913_s14 = scalar_select %p749_p11, 1, 0 }
  0x1d   : > { %p757_p13 = pnand %p385_p9, %p153_p12  ;;  %p761_p0 = scmp.eq.s32.totalorder %s383_s0, 0 }
  0x1e   : > { %s655_s18 = smov [#allocation5]   ;;  %s656_s21 = smov [#allocation8]  }
  0x1f   : > { %s914_s16 = scalar_select %p757_p13, 1, 0 }
  0x20   : > { %s915_s17 = scalar_select %p761_p0, 1, 0 }
  0x21   : > { %p409_p1 = pneg %p757_p13  ;;  %s165_s19 = sshll.u32 %s655_s18, 4  ;;  %s166_s19 = int_to_ptr.vmem [resolvable:$true] %s165_s19 }
  0x22   : > { %s179_s22 = sshll.u32 %s656_s21, 4  ;;  %s500_s25 = scalar_lea.hbm %s903_s1, 1024  ;;  %s773_s22 = int_to_ptr.vmem [resolvable:$true] %s179_s22 }
  0x23   : > { %p769_p2 = pnand %p761_p0, %p409_p1  ;;  %p501_p3 = scmp.ne.s32.totalorder %s903_s1, %s500_s25 }
  0x24   : > { %p507_p8 = scmp.lt.u32.totalorder %s500_s25, %s903_s1 }
  0x25   : > { %p502_p4 = pneg %p769_p2 }
  0x27   : > { %p503_p5 = pnand %p502_p4, %p501_p3 }
  0x29   : > { %p504_p6 = pneg %p503_p5 }
  0x2b   : > { %p509_p9 = pnand %p507_p8, %p504_p6 }
  0x2d   : > { %512 = shalt.err (!%p509_p9)
}
  0x2e   : > { %s513_s11 = scalar_lea.vmem %s166_s19, 1024  ;;  %p521_p11 = scmp.lt.s32.totalorder %s166_s19, %s166_s19 }
  0x2f   : > { %p514_p10 = scmp.ne.s32.totalorder %s166_s19, %s513_s11  ;;  %p522_p7 = scmp.lt.s32.totalorder %s513_s11, %s513_s11 }
  0x31   : > { %p516_p12 = pnand %p514_p10, %p502_p4  ;;  %p523_p0 = por %p522_p7, %p521_p11 }
  0x33   : > { %p517_p1 = pneg %p516_p12 }
  0x35   : > { %p524_p13 = pnand %p523_p0, %p517_p1 }
  0x37   : > { %527 = shalt.err (!%p524_p13)
}
  0x38   : > { %s657_s13 = smov 128   ;;  %s658_s18 = smov 8  }
  0x39   : > { %412 = dma.hbm_to_vmem [thread:$0]  (!%p769_p2), %s903_s1, 1024, %s166_s19, [#allocation6], %s657_s13, %s657_s13, %s658_s18  }
  0x3a   : > { %s528_s26 = scalar_lea.hbm %s904_s2, 128 }
  0x3b   : > { %p529_p3 = scmp.ne.s32.totalorder %s904_s2, %s528_s26  ;;  %p535_p13 = scmp.lt.u32.totalorder %s528_s26, %s904_s2 }
  0x3d   : > { %p531_p7 = pnand %p529_p3, %p502_p4 }
  0x3f   : > { %p532_p11 = pneg %p531_p7 }
  0x41   : > { %p537_p0 = pnand %p535_p13, %p532_p11 }
  0x43   : > { %540 = shalt.err (!%p537_p0)
}
  0x44   : > { %s541_s19 = scalar_lea.vmem %s773_s22, 128  ;;  %p549_p9 = scmp.lt.s32.totalorder %s773_s22, %s773_s22 }
  0x45   : > { %p542_p5 = scmp.ne.s32.totalorder %s773_s22, %s541_s19  ;;  %p550_p10 = scmp.lt.s32.totalorder %s541_s19, %s541_s19 }
  0x47   : > { %p544_p6 = pnand %p542_p5, %p502_p4  ;;  %p551_p12 = por %p550_p10, %p549_p9 }
  0x49   : > { %p545_p8 = pneg %p544_p6 }
  0x4b   : > { %p552_p1 = pnand %p551_p12, %p545_p8 }
  0x4d   : > { %555 = shalt.err (!%p552_p1)
}
  0x4e   : > { %415 = dma.hbm_to_vmem [thread:$0]  (!%p769_p2), %s904_s2, 128, %s773_s22, [#allocation9]  }
  0x4f   : > { %p917_p3 = scmp.ne.s32.totalorder %s914_s16, 0 }
  0x50   : > { %p918_p7 = scmp.ne.s32.totalorder (!%p917_p3), %s915_s17, 0 }
  0x51   : > { %198 = sbr.rel (%p917_p3) target bundleno = 459 (0x1cb), region = 36 }
  0x58   : > { %615 = dma.done.wait (%p918_p7), [#allocation6], 1024  }
  0x59   : > { %617 = vsyncadd (%p918_p7), [#allocation6], 4294966272 }
  0x5a   : > { %619 = dma.done.wait (%p918_p7), [#allocation9], 128  }
  0x5b   : > { %621 = vsyncadd (%p918_p7), [#allocation9], 4294967168  ;;  %s220_s20 = sand.u32 1, %s632_s29   ;;  %s392_s22 = sshll.u32 %s640_s6, 3 }
  0x5c   : > { %s836_s16 = sshll.u32 %s220_s20, 3  ;;  %s650_s23 = smov 0  }
  0x5d   : > { %s222_s21 = scalar_lea.vmem [#allocation10], %s836_s16 }
  0x5e LB: >> { %s232_s24 = sadd.s32 %s652_s23, %s392_s22  ;;  %s236_s17 = scalar_lea.vmem [#allocation2], %s652_s23  ;;  %s652_s23 = sphi %s650_s23, %s231_s23  }
  0x5f   : >> { %s233_s25 = sld [smem:[#allocation4 + %s232_s24]]  ;;  %s231_s23 = sadd.s32 1, %s652_s23  }
  0x60   : >> { %p228_p2 = scmp.ge.s32.totalorder %s231_s23, 8  }
  0x61   : > { %v240_v2 = vld [vmem:[#allocation8] sm:$0xff] (%p228_p2)  ;;  %v393_v20 = vld [vmem:[%s905_s3] ss:$0 sm:$0xff] (%p228_p2)  ;;  %s396_s19 = sshll.u32 (%p228_p2), %s640_s6, 7  ;;  %s296_s13 = sshll.u32 (%p228_p2), %s222_s21, 4  ;;  %s853_s13 = int_to_ptr.vmem [resolvable:$true] %s296_s13 }
  0x62   : > { %230 = sbr.rel (!%p228_p2) target bundleno = 94 (0x5e), region = 87  ;;  %v394_v22 = vld [vmem:[%s906_s4] ss:$0 sm:$0xff] (%p228_p2)  ;;  %s851_s23 = scalar_lea.hbm (%p228_p2), %s907_s5, %s396_s19 }
  0x63   : > { %s282_s24 = scalar_lea.sflag (%p228_p2), [#allocation7], %s220_s20  ;;  %p919_p11 = scmp.ne.s32.totalorder (%p228_p2), %s912_s12, 0 }
  0x64   : > { %s659_s6 = smov (%p228_p2), [#allocation10]  }
  0x65   : >> { %s234_s26 = scalar_lea.vmem [#allocation5], %s233_s25  ;;  %s556_s25 = scalar_lea.vmem (%p228_p2), %s853_s13, 128 }
  0x66   : >> { %v235_v0 = vld [vmem:[%s234_s26] sm:$0x1]  ;;  %p557_p4 = scmp.ne.s32.totalorder (%p228_p2), %s853_s13, %s556_s25  ;;  %s560_s26 = sshll.u32 (%p228_p2), %s659_s6, 4  ;;  %s561_s26 = int_to_ptr.vmem [resolvable:$false] %s560_s26 }
  0x67   : >> { %237 = vst [vmem:[%s236_s17] sm:$0x1] %v235_v0  ;;  %s562_s17 = scalar_lea.vmem (%p228_p2), %s561_s26, 256  ;;  %p563_p5 = scmp.lt.s32.totalorder (%p228_p2), %s853_s13, %s561_s26 }
  0x68   : > { %p558_p13 = pnand (%p228_p2), %p557_p4, %p919_p11  ;;  %p564_p6 = scmp.lt.s32.totalorder (%p228_p2), %s562_s17, %s556_s25 }
  0x6a   : > { %p559_p0 = pneg %p558_p13  ;;  %p565_p8 = por %p564_p6, %p563_p5 }
  0x6c   : > { %p566_p9 = pnand %p565_p8, %p559_p0 }
  0x6e   : > { %v238_v1 = vld [vmem:[#allocation2] sm:$0xff] }
  0x6f   : > { %v241_v3 = vadd.f32 %v240_v2, %v238_v1 }
  0x71   : > { %244 = vadd.xlane.f32.xlu0 %v241_v3 }
  0xfe   : > { %v245_v4 = vpop.xlane.xlu0 %244 }
  0xff   : > { %v247_v5 = vmul.f32 0.0078125, %v245_v4 }
 0x101   : > { %v248_v6 = vsub.f32 %v241_v3, %v247_v5 }
 0x103   : > { %v249_v7 = vmul.f32 %v248_v6, %v248_v6 }
 0x105   : > { %250 = vadd.xlane.f32.xlu0 %v249_v7 }
 0x192   : > { %v251_v8 = vpop.xlane.xlu0 %250 }
 0x193   : > { %v252_v9 = vmul.f32 0.007874016, %v251_v8 }
 0x195   : > { %486 = vrsqrt.f32 %v252_v9  ;;  %vm255_vm0 = vcmp.eq.f32.partialorder %v252_v9, inf  ;;  %v258_v12 = vand.u32 2147483648, %v252_v9  ;;  %vm257_vm1 = vcmp.eq.f32.partialorder %v252_v9, 0.0 }
 0x19f   : > { %v487_v10 = vpop.eup %486 }
 0x1a0   : > { %v254_v11 = vmul.f32 %v487_v10, %v252_v9 }
 0x1a2   : > { %v256_v13 = vsel %vm255_vm0, %v252_v9, %v254_v11 }
 0x1a3   : > { %v259_v14 = vsel %vm257_vm1, %v258_v12, %v256_v13 }
 0x1a4   : > { %v260_v15 = vadd.f32 1e-06, %v259_v14 }
 0x1a6   : > { %488 = vrcp.f32 %v260_v15 }
 0x1b0   : > { %v489_v16 = vpop.eup %488 }
 0x1b1   : > { %v262_v17 = vmul.f32 %v489_v16, %v260_v15 }
 0x1b3   : > { %v263_v18 = vsub.f32 2.0, %v262_v17 }
 0x1b5   : > { %v264_v19 = vmul.f32 %v489_v16, %v263_v18 }
 0x1b7   : > { %v265_v21 = vmul.f32 %v264_v19, %v248_v6 }
 0x1b9   : > { %v272_v23 = vmul.f32 %v393_v20, %v265_v21 }
 0x1bb   : > { %v279_v24 = vadd.f32 %v394_v22, %v272_v23 }
 0x1bd   : > { %280 = vst [vmem:[%s222_s21] sm:$0xff] %v279_v24 }
 0x1be   : > { %569 = shalt.err (!%p566_p9)
}
 0x1bf   : > { %s570_s20 = scalar_lea.hbm %s851_s23, 128  ;;  %s574_s27 = scalar_lea.hbm %s907_s5, 256 }
 0x1c0   : > { %p571_p10 = scmp.ne.s32.totalorder %s851_s23, %s570_s20  ;;  %p575_p3 = scmp.lt.u32.totalorder %s851_s23, %s907_s5 }
 0x1c1   : > { %p576_p7 = scmp.lt.u32.totalorder %s574_s27, %s570_s20  ;;  %p578_p4 = scmp.lt.u32.totalorder %s570_s20, %s851_s23 }
 0x1c2   : > { %p572_p12 = pnand %p571_p10, %p919_p11 }
 0x1c3   : > { %p577_p2 = por %p576_p7, %p575_p3 }
 0x1c4   : > { %p573_p1 = pneg %p572_p12 }
 0x1c5   : > { %p579_p13 = por %p578_p4, %p577_p2 }
 0x1c7   : > { %p580_p0 = pnand %p579_p13, %p573_p1 }
 0x1c9   : > { %583 = shalt.err (!%p580_p0)
}
 0x1ca   : > { %407 = dma.vmem_to_hbm [thread:$0]  (%p919_p11), %s853_s13, 128, %s851_s23, %s282_s24  }
 0x1cb PF: > { %p424_p5 = scmp.ge.s32.totalorder %s648_s8, 2  ;;  %s308_s11 = sand.u32 1, %s628_s28  }
 0x1cc   : > { %p920_p6 = scmp.ne.s32.totalorder %s913_s14, 0  ;;  %s309_s19 = scalar_lea.sflag [#allocation7], %s308_s11 }
 0x1ce   : > { %p417_p8 = pnand %p424_p5, %p920_p6 }
 0x1d0   : > { %623 = dma.done.wait (!%p417_p8), %s309_s19, 128  }
 0x1d1   : > { %625 = vsyncadd (!%p417_p8), %s309_s19, 4294967168  ;;  %s24_s8 = sadd.s32 1, %s648_s8   ;;  %s921_s28 = smov %s632_s29 }
 0x1d2   : > { %p21_p9 = scmp.ge.s32.totalorder %s24_s8, 4   ;;  %s922_s29 = smov %s636_s30 }
 0x1d3   : > { %s923_s30 = smov %s755_s15  ;;  %s924_s6 = smov %s644_s7 }
 0x1d4   : > { %s925_s7 = smov %s927_s10  ;;  %23 = sbr.rel (!%p21_p9) target bundleno = 18 (0x12), region = 98 }
 0x1db   :  { %314 = vsyncpa [#allocation6], 1 }
 0x1dc   :  { %316 = vsyncpa [#allocation6 + $0x1], 1 }
 0x1dd   :  { %317 = vsyncpa [#allocation9], 1 }
 0x1de   :  { %318 = vsyncpa [#allocation7], 1 }
 0x1df   :  { %320 = vsyncpa [#allocation7 + $0x1], 1 }

</bundles_post_ra>
